<compile_context>
chip_gen: v7x
topology: tpu7x:2x2x1
jax: 0.10.0
libtpu: 0.0.40
codegen_flags: <defaults>
</compile_context>

<pallas_src>
import jax
import jax.numpy as jnp
from jax.experimental import pallas as pl
from jax.experimental.pallas import tpu as pltpu

EPS = 1e-5


def _biasfree_ln_kernel(x_ref, w_ref, o_ref):
    # x_ref: (1, C, T)   w_ref: (C, 1)   o_ref: (1, C, T)
    xf = x_ref[...].astype(jnp.float32)                # (1, C, T)
    c = xf.shape[1]

    # Single moments sweep over the channel (sublane) axis.
    s1 = jnp.sum(xf, axis=1, keepdims=True)            # (1, 1, T)
    s2 = jnp.sum(xf * xf, axis=1, keepdims=True)       # (1, 1, T)
    inv_c = jnp.float32(1.0 / c)
    mu = s1 * inv_c
    var = s2 * inv_c - mu * mu
    # Guard against catastrophic cancellation driving var slightly negative.
    var = jnp.maximum(var, 0.0)
    inv = jax.lax.rsqrt(var + EPS)                     # (1, 1, T)  (EUP rsqrt)

    wf = w_ref[...].astype(jnp.float32)[None, :, :]    # (1, C, 1)
    # Compute in f32, cast once on store (no extra scale temporary, no second
    # read of x_ref).
    o_ref[...] = ((xf * inv) * wf).astype(o_ref.dtype)


def _pick_spatial_tile(hw, c, itemsize, batch, *, tile_bytes=2 << 20):
    """Largest 128-multiple lane tile whose input-dtype block is ~tile_bytes.

    Also caps the tile so the grid keeps enough steps for 2-TC megacore
    sharding (v7x) when the shape allows it.
    """
    hw128 = -(-hw // 128) * 128
    t = max(128, ((tile_bytes // (c * itemsize)) // 128) * 128)
    t = min(t, hw128)
    # Keep >= ~8 parallel grid steps if we can do so without tiny tiles.
    while batch * (-(-hw // t)) < 8 and (t // 2) >= 512:
        t = ((t // 2) // 128) * 128
    return t


def layernorm_biasfree(x, weight):
    """x: (B, C, H, W), weight: (C,). Returns (B, C, H, W)."""
    B, C, H, W = x.shape
    HW = H * W
    itemsize = jnp.dtype(x.dtype).itemsize

    t_hw = _pick_spatial_tile(HW, C, itemsize, B)
    n_spatial = pl.cdiv(HW, t_hw)   # last block may be partial -> masked store

    x3 = x.reshape(B, C, HW)
    w2 = weight.reshape(C, 1)

    cost = pl.CostEstimate(
        flops=6 * B * C * HW,
        transcendentals=B * HW,
        bytes_accessed=2 * B * C * HW * itemsize
        + C * jnp.dtype(weight.dtype).itemsize,
    )

    out = pl.pallas_call(
        _biasfree_ln_kernel,
        out_shape=jax.ShapeDtypeStruct((B, C, HW), x.dtype),
        grid_spec=pltpu.PrefetchScalarGridSpec(
            num_scalar_prefetch=0,
            grid=(B, n_spatial),
            in_specs=[
                pl.BlockSpec((1, C, t_hw), lambda b, s: (b, 0, s)),
                pl.BlockSpec((C, 1), lambda b, s: (0, 0)),
            ],
            out_specs=pl.BlockSpec((1, C, t_hw), lambda b, s: (b, 0, s)),
        ),
        compiler_params=pltpu.CompilerParams(
            # Every block is independent -> both axes parallel (v7x megacore).
            dimension_semantics=("parallel", "parallel"),
            # Explicit, generation-safe limit: ~2 MiB tiles keep
            # 2x(in)+2x(out) buffers + f32 temps well under this on all of
            # v5e / v6e / v7x (v7x physical VMEM is 64 MiB).
            vmem_limit_bytes=32 * 1024 * 1024,
        ),
        cost_estimate=cost,
    )(x3, w2)

    return out.reshape(B, C, H, W)


class LayerNormPallas:
    """Mirror of the PyTorch LayerNorm(dim, LayerNorm_type) module."""

    def __init__(self, dim, layernorm_type="BiasFree"):
        if layernorm_type != "BiasFree":
            # TODO(synk): LayerNorm2d (the WithBias path) is not defined in the
            # provided source; only the BiasFree path is implemented.
            raise NotImplementedError("Only 'BiasFree' LayerNorm is implemented.")
        self.dim = dim
        # nn.Parameter(torch.ones(dim)) -- deterministic init
        self.weight = jnp.ones((dim,), dtype=jnp.float32)

    def __call__(self, x):
        return layernorm_biasfree(x, self.weight)


def _reference(x, weight):
    # pure-JAX reference matching the PyTorch semantics (var over channel,
    # unbiased=False, no mean subtraction in output)
    var = jnp.var(x, axis=1, keepdims=True)
    return x / jnp.sqrt(var + EPS) * weight[None, :, None, None]


if __name__ == "__main__":
    key = jax.random.PRNGKey(0)
    B, C, H, W = 2, 4, 16, 16
    x = jax.random.normal(key, (B, C, H, W), dtype=jnp.float32)

    ln = LayerNormPallas(C, "BiasFree")
    y = ln(x)
    jax.block_until_ready(y)

    y_ref = _reference(x, ln.weight)
    assert y.shape == (B, C, H, W)
    assert jnp.allclose(y, y_ref, atol=1e-5, rtol=1e-5), (
        float(jnp.max(jnp.abs(y - y_ref))))

    print("KERNEL_OK")
</pallas_src>

<mosaic_0001>
module attributes {stable_mosaic.version = 11 : i64} {
  func.func @_biasfree_ln_kernel(%arg0: i32, %arg1: i32, %arg2: memref<1x4x256xf32, #tpu.memory_space<vmem>>, %arg3: memref<4x1xf32, #tpu.memory_space<vmem>>, %arg4: memref<1x4x256xf32, #tpu.memory_space<vmem>>) attributes {dimension_semantics = [#tpu.dimension_semantics<parallel>, #tpu.dimension_semantics<parallel>], iteration_bounds = array<i64: 2, 1>, scalar_prefetch = 0 : i64, scratch_operands = 0 : i64, tpu.core_type = #tpu.core_type<tc>, window_params = [{transform_indices = @transform_0, window_bounds = array<i64: 1, 4, 256>}, {pipeline_mode = #tpu.pipeline_mode<synchronous>, transform_indices = @transform_1, window_bounds = array<i64: 4, 1>}, {transform_indices = @transform_2, window_bounds = array<i64: 1, 4, 256>}]} {
    %c0 = arith.constant 0 : index
    %c0_0 = arith.constant 0 : index
    %c0_1 = arith.constant 0 : index
    %0 = vector.load %arg2[%c0, %c0_0, %c0_1] : memref<1x4x256xf32, #tpu.memory_space<vmem>>, vector<1x4x256xf32>
    %cst = arith.constant dense<0.000000e+00> : vector<1x256xf32>
    %1 = vector.multi_reduction <add>, %0, %cst [1] : vector<1x4x256xf32> to vector<1x256xf32>
    %2 = vector.shape_cast %1 : vector<1x256xf32> to vector<1x1x256xf32>
    %3 = arith.mulf %0, %0 : vector<1x4x256xf32>
    %cst_2 = arith.constant dense<0.000000e+00> : vector<1x256xf32>
    %4 = vector.multi_reduction <add>, %3, %cst_2 [1] : vector<1x4x256xf32> to vector<1x256xf32>
    %5 = vector.shape_cast %4 : vector<1x256xf32> to vector<1x1x256xf32>
    %cst_3 = arith.constant 2.500000e-01 : f32
    %6 = vector.broadcast %cst_3 : f32 to vector<1x1x256xf32>
    %7 = arith.mulf %2, %6 : vector<1x1x256xf32>
    %cst_4 = arith.constant 2.500000e-01 : f32
    %8 = vector.broadcast %cst_4 : f32 to vector<1x1x256xf32>
    %9 = arith.mulf %5, %8 : vector<1x1x256xf32>
    %10 = arith.mulf %7, %7 : vector<1x1x256xf32>
    %11 = arith.subf %9, %10 : vector<1x1x256xf32>
    %cst_5 = arith.constant 0.000000e+00 : f32
    %12 = vector.broadcast %cst_5 : f32 to vector<1x1x256xf32>
    %13 = arith.maximumf %11, %12 : vector<1x1x256xf32>
    %cst_6 = arith.constant 9.99999974E-6 : f32
    %14 = vector.broadcast %cst_6 : f32 to vector<1x1x256xf32>
    %15 = arith.addf %13, %14 : vector<1x1x256xf32>
    %16 = math.rsqrt %15 : vector<1x1x256xf32>
    %c0_7 = arith.constant 0 : index
    %c0_8 = arith.constant 0 : index
    %17 = vector.load %arg3[%c0_7, %c0_8] : memref<4x1xf32, #tpu.memory_space<vmem>>, vector<4x1xf32>
    %18 = vector.shape_cast %17 : vector<4x1xf32> to vector<1x4x1xf32>
    %19 = vector.broadcast %16 : vector<1x1x256xf32> to vector<1x4x256xf32>
    %20 = arith.mulf %0, %19 : vector<1x4x256xf32>
    %21 = vector.broadcast %18 : vector<1x4x1xf32> to vector<1x4x256xf32>
    %22 = arith.mulf %20, %21 : vector<1x4x256xf32>
    %c0_9 = arith.constant 0 : index
    %c0_10 = arith.constant 0 : index
    %c0_11 = arith.constant 0 : index
    %23 = vector.load %arg4[%c0_9, %c0_10, %c0_11] : memref<1x4x256xf32, #tpu.memory_space<vmem>>, vector<1x4x256xf32>
    tpu.vector_store %arg4[%c0_9, %c0_10, %c0_11], %22 {strides = array<i32>} : memref<1x4x256xf32, #tpu.memory_space<vmem>>, vector<1x4x256xf32>,
    return
  }
  func.func @transform_0(%arg0: i32, %arg1: i32) -> (i32, i32, i32) {
    %c0_i32 = arith.constant 0 : i32
    %c0_i32_0 = arith.constant 0 : i32
    return %arg0, %c0_i32, %arg1 : i32, i32, i32
  }
  func.func @transform_1(%arg0: i32, %arg1: i32) -> (i32, i32) {
    %c0_i32 = arith.constant 0 : i32
    %c0_i32_0 = arith.constant 0 : i32
    %c0_i32_1 = arith.constant 0 : i32
    return %c0_i32, %c0_i32_0 : i32, i32
  }
  func.func @transform_2(%arg0: i32, %arg1: i32) -> (i32, i32, i32) {
    %c0_i32 = arith.constant 0 : i32
    %c0_i32_0 = arith.constant 0 : i32
    return %arg0, %c0_i32, %arg1 : i32, i32, i32
  }
}

</mosaic_0001>

<bundles_post_ra>
// kernel: tpu_custom_call.1
= control target key start
LH: loop header
LB: loop body
LE: loop exit
PB: predicated region body
PF: predicated region fallthrough
CT: control target
= control target key end

     0   :  { %7 = vsyncpa [#allocation3], 0  ;;  %s751_s0 = inlined_call_operand.hbm [shape: f32[2,4,256], index: 0, kind: input, shape index: {}]   ;;  %s752_s1 = inlined_call_operand.vmem [shape: f32[4,1], index: 1, kind: input, shape index: {}]   ;;  %s753_s2 = inlined_call_operand.hbm [shape: f32[2,4,256], index: 2, kind: output, shape index: {}]  }
   0x1   :  { %9 = vsyncpa [#allocation3 + $0x1], 0 }
   0x2   :  { %10 = vsyncpa [#allocation4], 0 }
   0x3   :  { %12 = vsyncpa [#allocation4 + $0x1], 0  ;;  %s572_s9 = smov 0   ;;  %s574_s10 = smov 0  }
   0x4   :  { %s576_s11 = smov 0   ;;  %s578_s12 = smov 0  }
   0x5   :  { %s580_s13 = smov 0   ;;  %s582_s14 = smov 0  }
   0x6 LB: > { %s352_s15 = sadd.s32 4294967295, %s551_s14   ;;  %s353_s16 = sadd.s32 4294967294, %s551_s14   ;;  %s551_s14 = sphi %s582_s14, %s18_s14   ;;  %s547_s13 = sphi %s580_s13, %s769_s13   ;;  %s543_s12 = sphi %s578_s12, %s768_s12   ;;  %s539_s11 = sphi %s576_s11, %s767_s11   ;;  %s535_s10 = sphi %s574_s10, %s766_s10   ;;  %s531_s9 = sphi %s572_s9, %s765_s9  }
   0x7   : > { %s30_s17 = sadd.s32 1, %s547_s13  ;;  %s39_s18 = sadd.s32 1, %s539_s11 }
   0x8   : > { %p32_p0 = scmp.ge.s32.totalorder %s30_s17, 2  ;;  %p46_p1 = scmp.ne.s32.totalorder %s539_s11, %s535_s10 }
   0x9   : > { %p47_p2 = scmp.eq.s32.totalorder %s551_s14, 0  ;;  %p52_p3 = scmp.ne.s32.totalorder %s535_s10, %s531_s9 }
   0xa   : > { %s771_s17 = smov (%p32_p0, %s30_s17), 0  ;;  %p53_p5 = scmp.eq.s32.totalorder %s352_s15, 0 }
   0xb   : > { %p613_p4 = por %p47_p2, %p46_p1  ;;  %s34_s20 = ssub.s32 %s547_s13, %s771_s17 }
   0xc   : > { %p99_p6 = scmp.eq.s32.totalorder %s352_s15, 1  ;;  %p37_p7 = scmp.eq.s32.totalorder %s34_s20, 0 }
   0xd   : > { %p619_p8 = por %p53_p5, %p52_p3  ;;  %p105_p10 = scmp.eq.s32.totalorder %s353_s16, 1 }
   0xe   : > { %p623_p9 = por %p99_p6, %p46_p1  ;;  %p381_p13 = scmp.lt.s32.totalorder %s551_s14, 2 }
   0xf   : > { %s628_s23 = scalar_select %p37_p7, %s539_s11, %s39_s18  }
  0x10   : > { %s757_s22 = scalar_select %p623_p9, 1, 0 }
  0x11   : > { %p630_p11 = por %p105_p10, %p52_p3  ;;  %s128_s25 = sand.u32 1, %s539_s11  }
  0x12   : > { %s356_s26 = sshll.u32 %s128_s25, 3  ;;  %s367_s27 = sshll.u32 %s547_s13, 7 }
  0x13   : > { %s758_s24 = scalar_select %p630_p11, 1, 0 }
  0x14   : > { %s641_s30 = scalar_lea.hbm %s751_s0, %s367_s27  ;;  %s132_s3 = scalar_lea.vmem [#allocation2], %s356_s26 }
  0x15   : > { %s142_s4 = sshll.u32 %s132_s3, 4  ;;  %p647_p0 = pnand %p381_p13, %p613_p4  ;;  %s643_s4 = int_to_ptr.vmem [resolvable:$true] %s142_s4 }
  0x16   : > { %s129_s6 = scalar_lea.sflag [#allocation3], %s128_s25  ;;  %s439_s7 = scalar_lea.hbm %s641_s30, 128 }
  0x17   : > { %p440_p3 = scmp.ne.s32.totalorder %s641_s30, %s439_s7  ;;  %p441_p5 = pneg %p647_p0 }
  0x18   : > { %s444_s16 = scalar_lea.hbm %s751_s0, 256  ;;  %p445_p4 = scmp.lt.u32.totalorder %s641_s30, %s751_s0 }
  0x19   : > { %p442_p6 = pnand %p441_p5, %p440_p3  ;;  %p446_p10 = scmp.lt.u32.totalorder %s444_s16, %s439_s7 }
  0x1a   : > { %p448_p12 = scmp.lt.u32.totalorder %s439_s7, %s641_s30 }
  0x1b   : > { %p443_p7 = pneg %p442_p6  ;;  %p447_p13 = por %p446_p10, %p445_p4 }
  0x1d   : > { %p449_p1 = por %p448_p12, %p447_p13 }
  0x1f   : > { %p450_p2 = pnand %p449_p1, %p443_p7 }
  0x21   : > { %453 = shalt.err (!%p450_p2)
}
  0x22   : > { %s454_s20 = scalar_lea.vmem %s643_s4, 128  ;;  %s553_s25 = smov [#allocation2]  }
  0x23   : > { %p455_p3 = scmp.ne.s32.totalorder %s643_s4, %s454_s20  ;;  %s459_s26 = sshll.u32 %s553_s25, 4  ;;  %s460_s26 = int_to_ptr.vmem [resolvable:$false] %s459_s26 }
  0x24   : > { %s461_s27 = scalar_lea.vmem %s460_s26, 256  ;;  %p462_p9 = scmp.lt.s32.totalorder %s643_s4, %s460_s26 }
  0x25   : > { %p457_p6 = pnand %p455_p3, %p441_p5  ;;  %p463_p4 = scmp.lt.s32.totalorder %s461_s27, %s454_s20 }
  0x27   : > { %p458_p11 = pneg %p457_p6  ;;  %p464_p10 = por %p463_p4, %p462_p9 }
  0x29   : > { %p465_p12 = pnand %p464_p10, %p458_p11 }
  0x2b   : > { %468 = shalt.err (!%p465_p12)
}
  0x2c   : > { %376 = dma.hbm_to_vmem [thread:$0]  (!%p647_p0), %s641_s30, 128, %s643_s4, %s129_s6  }
  0x2d   : > { %p760_p1 = scmp.lt.s32.totalorder %s551_s14, 3  ;;  %p761_p2 = scmp.ge.s32.totalorder %s551_s14, 1 }
  0x2f   : > { %p148_p5 = pnand %p761_p2, %p760_p1 }
  0x30   : > { %s683_s28 = sand.u32 (!%p148_p5), 1, %s535_s10  }
  0x31   : > { %151 = sbr.rel (%p148_p5) target bundleno = 205 (0xcd), region = 28  ;;  %s360_s29 = sshll.u32 (!%p148_p5), %s683_s28, 3 }
  0x32   : > { %s154_s3 = scalar_lea.sflag (!%p148_p5), [#allocation3], %s683_s28  ;;  %s157_s5 = scalar_lea.vmem (!%p148_p5), [#allocation2], %s360_s29 }
  0x38   : > { %522 = dma.done.wait (%p619_p8), %s154_s3, 128  }
  0x39   : > { %524 = vsyncadd (%p619_p8), %s154_s3, 4294967168  ;;  %v554_v0 = vmov 0   ;;  %v231_v1 = vld [vmem:[%s752_s1] sm:$0xf]  ;;  %vm184_vm0 = vcmask 1043456   ;;  %v244_v48 = vlaneseq  ;;  %s368_s21 = sshll.u32 %s543_s12, 7 }
  0x3a   : > { %433 = vset.pattern.permute.xlu0 %v554_v0  ;;  %v180_v2 = vld [vmem:[%s157_s5] sm:$0xff]  ;;  %v555_v46 = vmov 839922192   ;;  %s177_s6 = scalar_lea.vmem [#allocation5], %s360_s29  ;;  %s702_s16 = scalar_lea.hbm %s753_s2, %s368_s21 }
  0x3b   : > { %239 = vperm.xlu0 %433, %v231_v1   ;;  %v182_v3 = vcombine.high %v180_v2, %v180_v2  ;;  %v199_v4 = vmul.f32 %v180_v2, %v180_v2  ;;  %v185_v5 = vsel %vm184_vm0, %v180_v2, 0.0  ;;  %v242_v47 = vunpack.c.l.s4 %v555_v46  ;;  %s268_s7 = sshll.u32 %s177_s6, 4  ;;  %s252_s18 = scalar_lea.sflag [#allocation4], %s683_s28  ;;  %s704_s7 = int_to_ptr.vmem [resolvable:$true] %s268_s7 }
  0x3c   : > { %v186_v8 = vrot.slane %v185_v5, 4  ;;  %v245_v52 = vshrl.u32 %v244_v48, 7  ;;  %s469_s19 = scalar_lea.vmem %s704_s7, 128  ;;  %p762_p9 = scmp.ne.s32.totalorder %s757_s22, 0 }
  0x3d   : > { %v192_v6 = vsel %vm184_vm0, %v182_v3, 0.0  ;;  %v201_v7 = vcombine.high %v199_v4, %v199_v4  ;;  %v203_v10 = vsel %vm184_vm0, %v199_v4, 0.0  ;;  %v243_v51 = vunpack.c.0.s8 %v242_v47  ;;  %p470_p8 = scmp.ne.s32.totalorder %s704_s7, %s469_s19  ;;  %s556_s12 = smov [#allocation5]  }
  0x3e   : > { %v193_v9 = vrot.slane %v192_v6, 4  ;;  %v187_v12 = vadd.f32 %v186_v8, %v185_v5  ;;  %v204_v13 = vrot.slane %v203_v10, 4  ;;  %s473_s20 = sshll.u32 %s556_s12, 4  ;;  %s474_s20 = int_to_ptr.vmem [resolvable:$false] %s473_s20 }
  0x3f   : > { %v210_v11 = vsel %vm184_vm0, %v201_v7, 0.0  ;;  %v246_v54 = vsub.s32 %v243_v51, %v245_v52  ;;  %p471_p11 = pnand %p470_p8, %p762_p9  ;;  %s475_s25 = scalar_lea.vmem %s474_s20, 256 }
  0x40   : > { %v194_v14 = vadd.f32 %v193_v9, %v192_v6  ;;  %v211_v15 = vrot.slane %v210_v11, 4  ;;  %v188_v16 = vrot.slane %v187_v12, 2  ;;  %v205_v17 = vadd.f32 %v204_v13, %v203_v10  ;;  %p476_p7 = scmp.lt.s32.totalorder %s704_s7, %s474_s20  ;;  %p477_p13 = scmp.lt.s32.totalorder %s475_s25, %s469_s19 }
  0x41   : > { %p472_p0 = pneg %p471_p11 }
  0x42   : > { %v195_v18 = vrot.slane %v194_v14, 2  ;;  %v212_v19 = vadd.f32 %v211_v15, %v210_v11  ;;  %v189_v20 = vadd.f32 %v188_v16, %v187_v12  ;;  %v206_v21 = vrot.slane %v205_v17, 2  ;;  %p478_p3 = por %p477_p13, %p476_p7 }
  0x44   : > { %v196_v22 = vadd.f32 %v195_v18, %v194_v14  ;;  %v213_v23 = vrot.slane %v212_v19, 2  ;;  %v190_v24 = vrot.slane %v189_v20, 1  ;;  %v207_v25 = vadd.f32 %v206_v21, %v205_v17  ;;  %p479_p6 = pnand %p478_p3, %p472_p0 }
  0x46   : > { %v197_v26 = vrot.slane %v196_v22, 1  ;;  %v214_v27 = vadd.f32 %v213_v23, %v212_v19  ;;  %v191_v28 = vadd.f32 %v190_v24, %v189_v20  ;;  %v208_v29 = vrot.slane %v207_v25, 1 }
  0x48   : > { %v198_v30 = vadd.f32 %v197_v26, %v196_v22  ;;  %v215_v31 = vrot.slane %v214_v27, 1  ;;  %v209_v32 = vadd.f32 %v208_v29, %v207_v25  ;;  %v217_v33 = vmul.f32 0.25, %v191_v28 }
  0x4a   : > { %v216_v34 = vadd.f32 %v215_v31, %v214_v27  ;;  %v218_v35 = vmul.f32 0.25, %v198_v30  ;;  %v219_v36 = vmul.f32 0.25, %v209_v32  ;;  %v221_v37 = vmul.f32 %v217_v33, %v217_v33 }
  0x4c   : > { %v220_v38 = vmul.f32 0.25, %v216_v34  ;;  %v222_v39 = vmul.f32 %v218_v35, %v218_v35  ;;  %v223_v40 = vsub.f32 %v219_v36, %v221_v37 }
  0x4e   : > { %v224_v41 = vsub.f32 %v220_v38, %v222_v39  ;;  %v225_v42 = vmax.f32 %v223_v40, 0.0 }
  0x50   : > { %v226_v43 = vmax.f32 %v224_v41, 0.0  ;;  %v227_v44 = vadd.f32 1e-05, %v225_v42 }
  0x52   : > { %v228_v45 = vadd.f32 1e-05, %v226_v43  ;;  %435 = vrsqrt.f32 %v227_v44 }
  0x54   : > { %437 = vrsqrt.f32 %v228_v45 }
  0x5c   : > { %v436_v49 = vpop.eup %435 }
  0x5e   : > { %v438_v50 = vpop.eup %437 }
  0x5f   : > { %v234_v53 = vcombine.low %v436_v49, %v438_v50 }
  0x61   : > { %v236_v55 = vmul.f32 %v234_v53, %v180_v2 }
  0xba   : > { %v240_v56 = vpop.permute.xlu0 %239 }
  0xbb   : > { %v247_v57 = vrot.slane %v240_v56, %v246_v54 }
  0xbd   : > { %v249_v58 = vmul.f32 %v247_v57, %v236_v55 }
  0xbf   : > { %250 = vst [vmem:[%s177_s6] sm:$0xff] %v249_v58 }
  0xc0   : > { %482 = shalt.err (!%p479_p6)
}
  0xc1   : > { %s483_s26 = scalar_lea.hbm %s702_s16, 128  ;;  %s487_s29 = scalar_lea.hbm %s753_s2, 256 }
  0xc2   : > { %p484_p4 = scmp.ne.s32.totalorder %s702_s16, %s483_s26  ;;  %p488_p1 = scmp.lt.u32.totalorder %s702_s16, %s753_s2 }
  0xc3   : > { %p489_p2 = scmp.lt.u32.totalorder %s487_s29, %s483_s26  ;;  %p491_p8 = scmp.lt.u32.totalorder %s483_s26, %s702_s16 }
  0xc4   : > { %p485_p10 = pnand %p484_p4, %p762_p9 }
  0xc5   : > { %p490_p5 = por %p489_p2, %p488_p1 }
  0xc6   : > { %p486_p12 = pneg %p485_p10 }
  0xc7   : > { %p492_p11 = por %p491_p8, %p490_p5 }
  0xc9   : > { %p493_p0 = pnand %p492_p11, %p486_p12 }
  0xcb   : > { %496 = shalt.err (!%p493_p0)
}
  0xcc   : > { %371 = dma.vmem_to_hbm [thread:$0]  (%p762_p9), %s704_s7, 128, %s702_s16, %s252_s18  }
  0xcd PF: > { %s280_s30 = sand.u32 1, %s531_s9   ;;  %p763_p7 = scmp.ne.s32.totalorder %s758_s24, 0 }
  0xce   : > { %p764_p13 = scmp.ge.s32.totalorder %s551_s14, 2  ;;  %s281_s4 = scalar_lea.sflag [#allocation4], %s280_s30 }
  0xd0   : > { %p378_p3 = pnand %p764_p13, %p763_p7 }
  0xd2   : > { %526 = dma.done.wait (!%p378_p3), %s281_s4, 128  }
  0xd3   : > { %528 = vsyncadd (!%p378_p3), %s281_s4, 4294967168  ;;  %s18_s14 = sadd.s32 1, %s551_s14   ;;  %s765_s9 = smov %s535_s10 }
  0xd4   : > { %p15_p6 = scmp.ge.s32.totalorder %s18_s14, 4   ;;  %s766_s10 = smov %s539_s11 }
  0xd5   : > { %s767_s11 = smov %s628_s23  ;;  %s768_s12 = smov %s547_s13 }
  0xd6   : > { %s769_s13 = smov %s771_s17  ;;  %17 = sbr.rel (!%p15_p6) target bundleno = 6 (0x6), region = 73 }
  0xdd   :  { %286 = vsyncpa [#allocation3], 1 }
  0xde   :  { %288 = vsyncpa [#allocation3 + $0x1], 1 }
  0xdf   :  { %289 = vsyncpa [#allocation4], 1 }
  0xe0   :  { %291 = vsyncpa [#allocation4 + $0x1], 1 }

</bundles_post_ra>
